<compile_context>
chip_gen: v5e
topology: v5e:2x2
jax: 0.10.0
libtpu: 0.0.40
codegen_flags: <defaults>
</compile_context>

<pallas_src>
import jax
import jax.numpy as jnp
from jax.experimental import pallas as pl
from jax.experimental.pallas import tpu as pltpu


# ---------------------------------------------------------------------------
# Kernel
# ---------------------------------------------------------------------------
def _transition_kernel(x_ref, scale_ref, shift_ref, w_ref, o_ref):
    # x_ref:     (TH, W//2, 2*Cin)      bf16  -- W-pairs folded into channels
    # scale_ref: (1, 2*Cin)             f32   -- folded BN scale, tiled x2
    # shift_ref: (1, 2*Cin)             f32   -- folded BN shift, tiled x2
    # w_ref:     (2*Cin, Cout)          bf16  -- [w; w] * 0.25
    # o_ref:     (TH//2, W//2, Cout)    out dtype
    x = x_ref[...].astype(jnp.float32)          # (TH, W2, C2)
    scale = scale_ref[0]                         # (C2,)
    shift = shift_ref[0]                         # (C2,)

    th, w2, c2 = x.shape
    cout = w_ref.shape[1]

    # BN (folded affine) + ReLU on the VPU, in f32.
    h = jnp.maximum(x * scale[None, None, :] + shift[None, None, :], 0.0)

    # H-pooling: split only the leading (untiled) dim -> whole-vreg adds,
    # no sublane/lane relayout.
    hh = h.reshape(th // 2, 2, w2, c2)
    hp = hh[:, 0] + hh[:, 1]                     # (TH//2, W2, C2)

    # 1x1 conv + W-pooling fused into one MXU matmul over 2*Cin
    # (W-pair sum is K-accumulation; 1/4 avg factor folded into w).
    m = (th // 2) * w2
    y = jnp.dot(hp.reshape(m, c2).astype(jnp.bfloat16),
                w_ref[...],
                preferred_element_type=jnp.float32)   # (M, Cout) f32

    o_ref[...] = y.reshape(th // 2, w2, cout).astype(o_ref.dtype)


# ---------------------------------------------------------------------------
# Tiling / VMEM sizing helpers
# ---------------------------------------------------------------------------
def _vmem_capacity_bytes():
    try:
        return int(pltpu.get_tpu_info().vmem_capacity_bytes)
    except Exception:
        return 64 << 20  # conservative (v7x per-TensorCore VMEM)


def _block_footprint_bytes(th, W, Cin, Cout, out_bytes):
    """VMEM footprint of one grid step, incl. double-buffering + temporaries."""
    in_blk = th * W * Cin * 2                         # bf16 input block
    out_blk = (th // 2) * (W // 2) * Cout * out_bytes
    weight = 2 * Cin * Cout * 2                       # (2*Cin, Cout) bf16
    params = 2 * (2 * Cin) * 4                        # scale + shift f32
    pipelined = 2 * (in_blk + out_blk + weight + params)   # double-buffered
    # in-kernel temporaries: f32 BN act, f32 H-pooled, bf16 matmul lhs, f32 out
    scratch = (th * W * Cin * 4
               + (th // 2) * W * Cin * (4 + 2)
               + (th // 2) * (W // 2) * Cout * 4)
    return pipelined + scratch


def _pick_row_tile(N, H, W, Cin, Cout, out_bytes, min_steps=4):
    """Largest even divisor of H whose block fits the VMEM budget, while
    keeping at least `min_steps` grid steps (feeds both v7x TensorCores)."""
    cap = _vmem_capacity_bytes()
    budget = int(cap * 0.6)  # headroom for compiler temporaries / pipelining
    divs = [d for d in range(2, H + 1, 2) if H % d == 0]
    if not divs:
        divs = [H]
    fitting = [d for d in divs
               if _block_footprint_bytes(d, W, Cin, Cout, out_bytes) <= budget]
    if not fitting:
        return min(divs), cap
    good = [d for d in fitting if N * (H // d) >= min_steps]
    return (max(good) if good else max(fitting)), cap


# ---------------------------------------------------------------------------
# Wrappers
# ---------------------------------------------------------------------------
def transition_forward_nhwc(x_nhwc, gamma, beta, conv_w, eps=1e-5,
                            out_dtype=jnp.bfloat16):
    """x_nhwc: (N, H, W, Cin); conv_w: (Cout, Cin, 1, 1) (PyTorch layout).
    Returns (N, H//2, W//2, Cout) in `out_dtype`. No layout transposes."""
    N, H, W, Cin = x_nhwc.shape
    Cout = conv_w.shape[0]
    assert H % 2 == 0 and W % 2 == 0, "AvgPool2d(2,2) path assumes even H and W"

    # --- glue: centered two-pass batch statistics (training-mode BN) -------
    xf = x_nhwc.astype(jnp.float32)
    mean = jnp.mean(xf, axis=(0, 1, 2))                        # (Cin,)
    var = jnp.mean(jnp.square(xf - mean[None, None, None, :]), axis=(0, 1, 2))
    scale = gamma.astype(jnp.float32) / jnp.sqrt(var + eps)
    shift = beta.astype(jnp.float32) - mean * scale
    # tiled x2 to match the [w-even chans | w-odd chans] folded channel dim
    scale2d = jnp.concatenate([scale, scale]).reshape(1, 2 * Cin)
    shift2d = jnp.concatenate([shift, shift]).reshape(1, 2 * Cin)

    # --- glue: weight (2*Cin, Cout), 0.25 pool factor folded, bf16 ---------
    w_mat = (jnp.transpose(conv_w[:, :, 0, 0], (1, 0)) * 0.25).astype(jnp.bfloat16)
    w2 = jnp.concatenate([w_mat, w_mat], axis=0)               # (2*Cin, Cout)

    # --- glue: bf16 activations, W-pairs folded into channels (free reshape)
    x_in = x_nhwc.astype(jnp.bfloat16).reshape(N, H, W // 2, 2 * Cin)

    out_bytes = jnp.dtype(out_dtype).itemsize
    th, cap = _pick_row_tile(N, H, W, Cin, Cout, out_bytes)
    grid = (N, H // th)

    need = _block_footprint_bytes(th, W, Cin, Cout, out_bytes)
    vmem_limit = int(min(cap, max(need + (4 << 20), 32 << 20)))

    flops = 2 * N * (H // 2) * (W // 2) * (2 * Cin) * Cout + 3 * N * H * W * Cin
    bytes_accessed = (x_in.size * 2
                      + N * (H // 2) * (W // 2) * Cout * out_bytes
                      + 2 * Cin * Cout * 2 + 4 * Cin * 4)

    out_nhwc = pl.pallas_call(
        _transition_kernel,
        out_shape=jax.ShapeDtypeStruct((N, H // 2, W // 2, Cout), out_dtype),
        grid_spec=pltpu.PrefetchScalarGridSpec(
            num_scalar_prefetch=0,
            grid=grid,
            in_specs=[
                pl.BlockSpec((pl.Squeezed(), th, W // 2, 2 * Cin),
                             lambda n, r: (n, r, 0, 0)),
                pl.BlockSpec((1, 2 * Cin), lambda n, r: (0, 0)),
                pl.BlockSpec((1, 2 * Cin), lambda n, r: (0, 0)),
                pl.BlockSpec((2 * Cin, Cout), lambda n, r: (0, 0)),
            ],
            out_specs=pl.BlockSpec((pl.Squeezed(), th // 2, W // 2, Cout),
                                   lambda n, r: (n, r, 0, 0)),
        ),
        compiler_params=pltpu.CompilerParams(
            dimension_semantics=("parallel", "parallel"),
            vmem_limit_bytes=vmem_limit),
        cost_estimate=pl.CostEstimate(flops=int(flops), transcendentals=0,
                                      bytes_accessed=int(bytes_accessed)),
    )(x_in, scale2d, shift2d, w2)

    return out_nhwc


def transition_forward(x_nchw, gamma, beta, conv_w, eps=1e-5,
                       out_dtype=jnp.bfloat16):
    """Convenience wrapper for PyTorch NCHW layout callers; prefer the NHWC
    entry point (each transpose here is a full HBM pass over the activation)."""
    x_nhwc = jnp.transpose(x_nchw, (0, 2, 3, 1))
    out = transition_forward_nhwc(x_nhwc, gamma, beta, conv_w, eps, out_dtype)
    return jnp.transpose(out, (0, 3, 1, 2))


# ---------------------------------------------------------------------------
# Pure-JAX reference (PyTorch NCHW semantics)
# ---------------------------------------------------------------------------
def _reference_nchw(x, gamma, beta, conv_w, eps=1e-5):
    mean = jnp.mean(x, axis=(0, 2, 3), keepdims=True)
    var = jnp.mean(jnp.square(x - mean), axis=(0, 2, 3), keepdims=True)
    xn = (x - mean) / jnp.sqrt(var + eps)
    h = jnp.maximum(xn * gamma[None, :, None, None] + beta[None, :, None, None], 0.0)
    y = jnp.einsum('nchw,oc->nohw', h, conv_w[:, :, 0, 0])
    n, co, hh, ww = y.shape
    y = y.reshape(n, co, hh // 2, 2, ww // 2, 2)
    return y.mean(axis=(3, 5))


if __name__ == "__main__":
    # Small shapes consistent with a DenseNet transition (compression = 0.5).
    N, Cin, Cout, H, W = 2, 16, 8, 16, 16

    key = jax.random.PRNGKey(0)
    kx, kw, kg, kb = jax.random.split(key, 4)

    # Activations kept NHWC end-to-end on the kernel path (no transposes).
    x_nhwc = jax.random.normal(kx, (N, H, W, Cin), dtype=jnp.float32)
    conv_w = jax.random.normal(kw, (Cout, Cin, 1, 1), dtype=jnp.float32) * 0.1
    gamma = 1.0 + 0.1 * jax.random.normal(kg, (Cin,), dtype=jnp.float32)
    beta = 0.1 * jax.random.normal(kb, (Cin,), dtype=jnp.float32)

    out_nhwc = transition_forward_nhwc(x_nhwc, gamma, beta, conv_w)
    out_nhwc = jax.block_until_ready(out_nhwc)
    assert out_nhwc.shape == (N, H // 2, W // 2, Cout)

    # Reference check in PyTorch (NCHW) semantics; transposes are test glue only.
    ref = _reference_nchw(jnp.transpose(x_nhwc, (0, 3, 1, 2)), gamma, beta, conv_w)
    out = jnp.transpose(out_nhwc.astype(jnp.float32), (0, 3, 1, 2))

    err = float(jnp.max(jnp.abs(out - ref)))
    # bf16 activations/weights/output (f32 accumulation) => loosened tolerance.
    assert jnp.allclose(out, ref, atol=3e-2, rtol=3e-2), err

    print("KERNEL_OK")
</pallas_src>

<mosaic_0001>
module attributes {stable_mosaic.version = 11 : i64} {
  func.func @_transition_kernel(%arg0: i32, %arg1: i32, %arg2: memref<1x8x8x32xbf16, #tpu.memory_space<vmem>>, %arg3: memref<1x32xf32, #tpu.memory_space<vmem>>, %arg4: memref<1x32xf32, #tpu.memory_space<vmem>>, %arg5: memref<32x8xbf16, #tpu.memory_space<vmem>>, %arg6: memref<1x4x8x8xbf16, #tpu.memory_space<vmem>>) attributes {dimension_semantics = [#tpu.dimension_semantics<parallel>, #tpu.dimension_semantics<parallel>], iteration_bounds = array<i64: 2, 2>, scalar_prefetch = 0 : i64, scratch_operands = 0 : i64, tpu.core_type = #tpu.core_type<tc>, window_params = [{transform_indices = @transform_0, window_bounds = array<i64: 1, 8, 8, 32>}, {pipeline_mode = #tpu.pipeline_mode<synchronous>, transform_indices = @transform_1, window_bounds = array<i64: 1, 32>}, {pipeline_mode = #tpu.pipeline_mode<synchronous>, transform_indices = @transform_2, window_bounds = array<i64: 1, 32>}, {pipeline_mode = #tpu.pipeline_mode<synchronous>, transform_indices = @transform_3, window_bounds = array<i64: 32, 8>}, {transform_indices = @transform_4, window_bounds = array<i64: 1, 4, 8, 8>}]} {
    %c0 = arith.constant 0 : index
    %c0_0 = arith.constant 0 : index
    %c0_1 = arith.constant 0 : index
    %c0_2 = arith.constant 0 : index
    %0 = vector.load %arg2[%c0, %c0_0, %c0_1, %c0_2] : memref<1x8x8x32xbf16, #tpu.memory_space<vmem>>, vector<1x8x8x32xbf16>
    %1 = vector.shape_cast %0 : vector<1x8x8x32xbf16> to vector<8x8x32xbf16>
    %2 = arith.extf %1 : vector<8x8x32xbf16> to vector<8x8x32xf32>
    %c0_3 = arith.constant 0 : index
    %c0_4 = arith.constant 0 : index
    %3 = vector.load %arg3[%c0_3, %c0_4] : memref<1x32xf32, #tpu.memory_space<vmem>>, vector<1x32xf32>
    %4 = vector.shape_cast %3 : vector<1x32xf32> to vector<32xf32>
    %c0_5 = arith.constant 0 : index
    %c0_6 = arith.constant 0 : index
    %5 = vector.load %arg4[%c0_5, %c0_6] : memref<1x32xf32, #tpu.memory_space<vmem>>, vector<1x32xf32>
    %6 = vector.shape_cast %5 : vector<1x32xf32> to vector<32xf32>
    %7 = vector.shape_cast %4 : vector<32xf32> to vector<1x1x32xf32>
    %8 = vector.broadcast %7 : vector<1x1x32xf32> to vector<8x8x32xf32>
    %9 = arith.mulf %2, %8 : vector<8x8x32xf32>
    %10 = vector.shape_cast %6 : vector<32xf32> to vector<1x1x32xf32>
    %11 = vector.broadcast %10 : vector<1x1x32xf32> to vector<8x8x32xf32>
    %12 = arith.addf %9, %11 : vector<8x8x32xf32>
    %cst = arith.constant 0.000000e+00 : f32
    %13 = vector.broadcast %cst : f32 to vector<8x8x32xf32>
    %14 = arith.maximumf %12, %13 : vector<8x8x32xf32>
    %15 = vector.shape_cast %14 : vector<8x8x32xf32> to vector<4x2x8x32xf32>
    %16 = vector.extract_strided_slice %15 {offsets = [0, 0, 0, 0], sizes = [4, 1, 8, 32], strides = [1, 1, 1, 1]} : vector<4x2x8x32xf32> to vector<4x1x8x32xf32>
    %17 = vector.shape_cast %16 : vector<4x1x8x32xf32> to vector<4x8x32xf32>
    %18 = vector.extract_strided_slice %15 {offsets = [0, 1, 0, 0], sizes = [4, 1, 8, 32], strides = [1, 1, 1, 1]} : vector<4x2x8x32xf32> to vector<4x1x8x32xf32>
    %19 = vector.shape_cast %18 : vector<4x1x8x32xf32> to vector<4x8x32xf32>
    %20 = arith.addf %17, %19 : vector<4x8x32xf32>
    %21 = vector.shape_cast %20 : vector<4x8x32xf32> to vector<32x32xf32>
    %22 = arith.truncf %21 : vector<32x32xf32> to vector<32x32xbf16>
    %c0_7 = arith.constant 0 : index
    %c0_8 = arith.constant 0 : index
    %23 = vector.load %arg5[%c0_7, %c0_8] : memref<32x8xbf16, #tpu.memory_space<vmem>>, vector<32x8xbf16>
    %cst_9 = arith.constant dense<0.000000e+00> : vector<32x8xf32>
    %24 = tpu.matmul %22, %23, %cst_9 {dimension_numbers = #tpu.dot_dimension_numbers<[1], [0], [0], [1], [0, 0, 1, 1], [], []>} : vector<32x32xbf16>, vector<32x8xbf16>, vector<32x8xf32> -> vector<32x8xf32>
    %25 = vector.shape_cast %24 : vector<32x8xf32> to vector<4x8x8xf32>
    %26 = arith.truncf %25 : vector<4x8x8xf32> to vector<4x8x8xbf16>
    %c0_10 = arith.constant 0 : index
    %c0_11 = arith.constant 0 : index
    %c0_12 = arith.constant 0 : index
    %c0_13 = arith.constant 0 : index
    %27 = vector.load %arg6[%c0_10, %c0_11, %c0_12, %c0_13] : memref<1x4x8x8xbf16, #tpu.memory_space<vmem>>, vector<1x4x8x8xbf16>
    %28 = vector.shape_cast %27 : vector<1x4x8x8xbf16> to vector<4x8x8xbf16>
    %29 = vector.shape_cast %26 : vector<4x8x8xbf16> to vector<1x4x8x8xbf16>
    tpu.vector_store %arg6[%c0_10, %c0_11, %c0_12, %c0_13], %29 {strides = array<i32>} : memref<1x4x8x8xbf16, #tpu.memory_space<vmem>>, vector<1x4x8x8xbf16>,
    return
  }
  func.func @transform_0(%arg0: i32, %arg1: i32) -> (i32, i32, i32, i32) {
    %c0_i32 = arith.constant 0 : i32
    %c0_i32_0 = arith.constant 0 : i32
    %c0_i32_1 = arith.constant 0 : i32
    return %arg0, %arg1, %c0_i32, %c0_i32_0 : i32, i32, i32, i32
  }
  func.func @transform_1(%arg0: i32, %arg1: i32) -> (i32, i32) {
    %c0_i32 = arith.constant 0 : i32
    %c0_i32_0 = arith.constant 0 : i32
    %c0_i32_1 = arith.constant 0 : i32
    return %c0_i32, %c0_i32_0 : i32, i32
  }
  func.func @transform_2(%arg0: i32, %arg1: i32) -> (i32, i32) {
    %c0_i32 = arith.constant 0 : i32
    %c0_i32_0 = arith.constant 0 : i32
    %c0_i32_1 = arith.constant 0 : i32
    return %c0_i32, %c0_i32_0 : i32, i32
  }
  func.func @transform_3(%arg0: i32, %arg1: i32) -> (i32, i32) {
    %c0_i32 = arith.constant 0 : i32
    %c0_i32_0 = arith.constant 0 : i32
    %c0_i32_1 = arith.constant 0 : i32
    return %c0_i32, %c0_i32_0 : i32, i32
  }
  func.func @transform_4(%arg0: i32, %arg1: i32) -> (i32, i32, i32, i32) {
    %c0_i32 = arith.constant 0 : i32
    %c0_i32_0 = arith.constant 0 : i32
    %c0_i32_1 = arith.constant 0 : i32
    return %arg0, %arg1, %c0_i32, %c0_i32_0 : i32, i32, i32, i32
  }
}

</mosaic_0001>

<bundles_post_ra>
// kernel: tpu_custom_call.1
= control target key start
LH: loop header
LB: loop body
LE: loop exit
PB: predicated region body
PF: predicated region fallthrough
CT: control target
= control target key end

     0   :  { %9 = vsyncpa [#allocation3], 0  ;;  %s904_s0 = inlined_call_operand.hbm [shape: bf16[2,16,8,32], index: 0, kind: input, shape index: {}]   ;;  %s905_s1 = inlined_call_operand.vmem [shape: f32[1,32], index: 1, kind: input, shape index: {}]   ;;  %s906_s2 = inlined_call_operand.vmem [shape: f32[1,32], index: 2, kind: input, shape index: {}]   ;;  %s907_s3 = inlined_call_operand.vmem [shape: bf16[32,8], index: 3, kind: input, shape index: {}]   ;;  %s908_s4 = inlined_call_operand.hbm [shape: bf16[2,8,8,8], index: 4, kind: output, shape index: {}]  }
   0x1   :  { %11 = vsyncpa [#allocation3 + $0x1], 0 }
   0x2   :  { %12 = vsyncpa [#allocation4], 0 }
   0x3   :  { %14 = vsyncpa [#allocation4 + $0x1], 0  ;;  %s745_s15 = smov 0   ;;  %s747_s16 = smov 0  }
   0x4   :  { %s749_s17 = smov 0   ;;  %s751_s18 = smov 0  }
   0x5   :  { %s753_s19 = smov 0   ;;  %s755_s20 = smov 0  }
   0x6   :  { %s757_s21 = smov 0   ;;  %s759_s22 = smov 0  }
   0x7 LB: > { %912 = sst [smem:[#allocation8_spill]] %s694_s17  ;;  %s452_s23 = sadd.s32 4294967295, %s714_s22   ;;  %s714_s22 = sphi %s759_s22, %s20_s22   ;;  %s710_s21 = sphi %s757_s21, %s929_s21   ;;  %s706_s20 = sphi %s755_s20, %s928_s20   ;;  %s702_s19 = sphi %s753_s19, %s927_s19   ;;  %s698_s18 = sphi %s751_s18, %s926_s18   ;;  %s694_s17 = sphi %s749_s17, %s921_s17   ;;  %s690_s16 = sphi %s747_s16, %s925_s16   ;;  %s686_s15 = sphi %s745_s15, %s924_s15  }
   0x8   : > { %s453_s24 = sadd.s32 4294967294, %s714_s22   ;;  %s29_s25 = sadd.s32 1, %s706_s20 }
   0x9   : > { %s32_s26 = sadd.s32 1, %s710_s21  ;;  %p30_p0 = scmp.ge.s32.totalorder %s29_s25, 2 }
   0xa   : > { %s41_s27 = sadd.s32 1, %s694_s17  ;;  %p48_p1 = scmp.ne.s32.totalorder %s694_s17, %s690_s16 }
   0xb   : > { %p49_p2 = scmp.eq.s32.totalorder %s714_s22, 0  ;;  %s931_s25 = smov (%p30_p0, %s29_s25), 0 }
   0xc   : > { %913 = sst [smem:[#allocation9_spill]] %s931_s25  ;;  %s933_s26 = smov (!%p30_p0, %s32_s26), %s710_s21 }
   0xd   : > { %s37_s28 = ssub.s32 %s706_s20, %s931_s25  ;;  %p798_p3 = por %p49_p2, %p48_p1 }
   0xe   : > { %p34_p4 = scmp.ge.s32.totalorder %s933_s26, 2  ;;  %p54_p5 = scmp.ne.s32.totalorder %s690_s16, %s686_s15 }
   0xf   : > { %p55_p6 = scmp.eq.s32.totalorder %s452_s23, 0  ;;  %p143_p7 = scmp.eq.s32.totalorder %s452_s23, 3 }
  0x10   : > { %s935_s26 = smov (%p34_p4, %s933_s26), 0  ;;  %p149_p10 = scmp.eq.s32.totalorder %s453_s24, 3 }
  0x11   : > { %915 = sst [smem:[#allocation10_spill]] %s935_s26  ;;  %p806_p8 = por %p55_p6, %p54_p5 }
  0x12   : > { %p810_p9 = por %p143_p7, %p48_p1  ;;  %s36_s6 = ssub.s32 %s710_s21, %s935_s26 }
  0x13   : > { %s38_s7 = sor.u32 %s37_s28, %s36_s6  ;;  %p816_p12 = por %p149_p10, %p54_p5 }
  0x14   : > { %p39_p11 = scmp.eq.s32.totalorder %s38_s7, 0  ;;  %p514_p13 = scmp.lt.s32.totalorder %s714_s22, 4 }
  0x15   : > { %s178_s9 = sand.u32 1, %s694_s17   ;;  %s457_s12 = sshll.u32 %s706_s20, 3 }
  0x16   : > { %s823_s10 = scalar_select %p39_p11, %s694_s17, %s41_s27  }
  0x17   : > { %s456_s11 = sshll.u32 %s178_s9, 5  ;;  %s458_s13 = sshll.u32 %s710_s21, 4 }
  0x18   : > { %919 = sst [smem:[#allocation11_spill]] %s823_s10  ;;  %s182_s14 = scalar_lea.vmem [#allocation2], %s456_s11 }
  0x19   : > { %s192_s23 = sshll.u32 %s182_s14, 4  ;;  %s187_s26 = sadd.s32 %s458_s13, %s457_s12  ;;  %s193_s23 = int_to_ptr.vmem [resolvable:$true] %s192_s23 }
  0x1a   : > { %s459_s24 = sshll.u32 %s187_s26, 2  ;;  %p507_p0 = pnand %p514_p13, %p798_p3 }
  0x1b   : > { %s189_s7 = scalar_lea.hbm %s904_s0, %s459_s24  ;;  %s179_s27 = scalar_lea.sflag [#allocation3], %s178_s9 }
  0x1c   : > { %s190_s25 = sshll.u32 %s189_s7, 4  ;;  %s716_s10 = smov 64   ;;  %s191_s25 = int_to_ptr.hbm [resolvable:$true] %s190_s25 }
  0x1d   : > { %s717_s17 = smov 4   ;;  %p460_p1 = scmp.ge.s32.totalorder %s714_s22, 1 }
  0x1e   : > { %509 = dma.hbm_to_vmem [thread:$0]  (!%p507_p0), %s191_s25, 512, %s193_s23, %s179_s27, %s716_s10, %s716_s10, %s717_s17  }
  0x1f   : > { %p200_p2 = scmp.lt.s32.totalorder %s714_s22, 5 }
  0x21   : > { %p201_p4 = pnand %p460_p1, %p200_p2 }
  0x22   : > { %s835_s11 = sand.u32 (!%p201_p4), 1, %s690_s16  }
  0x23   : > { %204 = sbr.rel (%p201_p4) target bundleno = 198 (0xc6), region = 36  ;;  %s461_s26 = sshll.u32 (!%p201_p4), %s835_s11, 5 }
  0x24   : > { %s207_s29 = scalar_lea.sflag (!%p201_p4), [#allocation3], %s835_s11  ;;  %s210_s12 = scalar_lea.vmem (!%p201_p4), [#allocation2], %s461_s26 }
  0x28   : > { %677 = dma.done.wait (%p806_p8), %s207_s29, 512  }
  0x29   : > { %679 = vsyncadd (%p806_p8), %s207_s29, 4294966784  ;;  %v480_v0 = vld [vmem:[%s907_s3 + $0x8] sm:$0xff]  ;;  %v479_v1 = vld [vmem:[%s907_s3] sm:$0xff]  ;;  %vm309_vm0 = vcmask 261120   ;;  %s474_s24 = sshll.u32 %s698_s18, 2  ;;  %s475_s28 = sshll.u32 %s702_s19, 3 }
  0x2a   : > { %v482_v2 = vld [vmem:[%s210_s12] sm:$0xff]   ;;  %v497_v5 = vld [vmem:[%s210_s12 + $0x8] sm:$0xff]   ;;  %322 = vmatpush.bf16.msra.mxu0 %v480_v0  ;;  %500 = vmatpush.bf16.msra.mxu1 %v480_v0  ;;  %v498_v10 = vld [vmem:[%s210_s12 + $0x10] sm:$0xff]   ;;  %s462_s6 = sshll.u32 %s835_s11, 4  ;;  %s356_s7 = sadd.s32 %s475_s28, %s474_s24  ;;  %vm339_vm1 = vcmask 60416  }
  0x2b   : > { %v483_v3 = vunpack.c.l.bf16 %v482_v2  ;;  %v484_v4 = vunpack.c.h.bf16 %v482_v2  ;;  %v487_v6 = vunpack.c.l.bf16 %v497_v5  ;;  %v488_v7 = vunpack.c.h.bf16 %v497_v5  ;;  %v584_v8 = vld [vmem:[%s905_s1] ss:$0 sm:$0xff]  ;;  %v499_v13 = vld [vmem:[%s210_s12 + $0x18] sm:$0xff]   ;;  %s476_s27 = sshll.u32 %s356_s7, 2  ;;  %s235_s26 = scalar_lea.vmem [#allocation5], %s462_s6 }
  0x2c   : > { %v585_v9 = vld [vmem:[%s906_s2] ss:$0 sm:$0xff]  ;;  %v491_v11 = vunpack.c.l.bf16 %v498_v10  ;;  %v492_v12 = vunpack.c.h.bf16 %v498_v10  ;;  %v495_v18 = vunpack.c.l.bf16 %v499_v13  ;;  %v496_v19 = vunpack.c.h.bf16 %v499_v13  ;;  %s358_s9 = scalar_lea.hbm %s908_s4, %s476_s27  ;;  %s359_s18 = sshll.u32 %s235_s26, 4  ;;  %s360_s18 = int_to_ptr.vmem [resolvable:$true] %s359_s18 }
  0x2d   : > { %v260_v14 = vmul.f32 %v584_v8, %v483_v3  ;;  %v261_v15 = vmul.f32 %v584_v8, %v484_v4  ;;  %v262_v16 = vmul.f32 %v584_v8, %v487_v6  ;;  %v263_v17 = vmul.f32 %v584_v8, %v488_v7  ;;  %s361_s19 = sshll.u32 %s358_s9, 4  ;;  %s345_s17 = scalar_lea.sflag [#allocation4], %s835_s11  ;;  %s362_s19 = int_to_ptr.hbm [resolvable:$true] %s361_s19 }
  0x2e   : > { %v264_v20 = vmul.f32 %v584_v8, %v491_v11  ;;  %v265_v21 = vmul.f32 %v584_v8, %v492_v12  ;;  %323 = vmatpush.bf16.msra.mxu0 %v479_v1  ;;  %501 = vmatpush.bf16.msra.mxu1 %v479_v1  ;;  %v266_v26 = vmul.f32 %v584_v8, %v495_v18  ;;  %s630_s25 = sshra.s32 %s362_s19, 4  ;;  %s636_s30 = scalar_lea.hbm %s908_s4, 64  ;;  %s631_s25 = int_to_ptr.hbm [resolvable:$true] %s630_s25 }
  0x2f   : > { %v271_v22 = vadd.f32 %v585_v9, %v260_v14  ;;  %v272_v23 = vadd.f32 %v585_v9, %v261_v15  ;;  %v273_v24 = vadd.f32 %v585_v9, %v262_v16  ;;  %v274_v25 = vadd.f32 %v585_v9, %v263_v17  ;;  %s632_s10 = scalar_lea.hbm %s631_s25, 16  ;;  %p637_p7 = scmp.lt.s32.totalorder %s631_s25, %s908_s4 }
  0x30   : > { %v267_v27 = vmul.f32 %v584_v8, %v496_v19  ;;  %v275_v28 = vadd.f32 %v585_v9, %v264_v20  ;;  %v276_v32 = vadd.f32 %v585_v9, %v265_v21  ;;  %v277_v34 = vadd.f32 %v585_v9, %v266_v26  ;;  %p633_p3 = scmp.ne.s32.totalorder %s631_s25, %s632_s10  ;;  %p638_p8 = scmp.lt.s32.totalorder %s636_s30, %s632_s10 }
  0x31   : > { %v279_v29 = vmax.f32 %v271_v22, 0.0  ;;  %v280_v30 = vmax.f32 %v272_v23, 0.0  ;;  %v281_v31 = vmax.f32 %v273_v24, 0.0  ;;  %v282_v33 = vmax.f32 %v274_v25, 0.0 }
  0x32   : > { %v278_v35 = vadd.f32 %v585_v9, %v267_v27  ;;  %v283_v36 = vmax.f32 %v275_v28, 0.0  ;;  %v284_v38 = vmax.f32 %v276_v32, 0.0  ;;  %v285_v40 = vmax.f32 %v277_v34, 0.0  ;;  %p634_p5 = pnand %p633_p3, %p810_p9  ;;  %p639_p10 = por %p638_p8, %p637_p7 }
  0x33   : > { %v287_v37 = vadd.f32 %v280_v30, %v279_v29  ;;  %v288_v39 = vadd.f32 %v282_v33, %v281_v31 }
  0x34   : > { %v286_v41 = vmax.f32 %v278_v35, 0.0  ;;  %v289_v42 = vadd.f32 %v284_v38, %v283_v36  ;;  %p635_p6 = pneg %p634_p5 }
  0x35   : > { %v291_v43 = vpack.c.bf16 %v288_v39, %v287_v37 }
  0x36   : > { %v290_v44 = vadd.f32 %v286_v41, %v285_v40  ;;  %p640_p11 = pnand %p639_p10, %p635_p6 }
  0x37   : > { %471 = vmatmul.msk.bf16.vlgmr.msra.gmra.mxu0 %vm309_vm0, %v291_v43 }
  0x38   : > { %v292_v45 = vpack.c.bf16 %v290_v44, %v289_v42 }
  0x3a   : > { %472 = vmatmul.msk.bf16.vlgmr.msra.gmra.mxu1 %vm309_vm0, %v292_v45 }
  0xb4   : > { %v325_v46 = vpop.f32.mrf.mxu0 }
  0xb5   : > { %v335_v47 = vpack.c.bf16 %v325_v46, %v325_v46 }
  0xb7   : > { %v330_v48 = vpop.f32.mrf.mxu1  ;;  %340 = vst.msk [vmem:[%s235_s26] sm:$0xf] %vm339_vm1, %v335_v47 }
  0xb8   : > { %v337_v49 = vpack.c.bf16 %v330_v48, %v330_v48 }
  0xba   : > { %342 = vst.msk [vmem:[%s235_s26 + $0x8] sm:$0xf] %vm339_vm1, %v337_v49 }
  0xbc   : > { %v327_v50 = vpop.f32.mrf.mxu0 }
  0xbd   : > { %v336_v51 = vpack.c.bf16 %v327_v50, %v327_v50 }
  0xbf   : > { %v332_v52 = vpop.f32.mrf.mxu1  ;;  %341 = vst.msk [vmem:[%s235_s26 + $0x4] sm:$0xf] %vm339_vm1, %v336_v51 }
  0xc0   : > { %v338_v53 = vpack.c.bf16 %v332_v52, %v332_v52 }
  0xc2   : > { %343 = vst.msk [vmem:[%s235_s26 + $0xc] sm:$0xf] %vm339_vm1, %v338_v53 }
  0xc3   : > { %643 = shalt.err (!%p640_p11)
}
  0xc4   : > { %s718_s11 = smov 64   ;;  %s719_s28 = smov 4  }
  0xc5   : > { %504 = dma.vmem_to_hbm [thread:$0]  (%p810_p9), %s360_s18, 256, %s362_s19, %s345_s17, %s718_s11, %s718_s11, %s719_s28  }
  0xc6 PF: > { %p515_p13 = scmp.ge.s32.totalorder %s714_s22, 2  ;;  %s376_s6 = sand.u32 1, %s686_s15  }
  0xc7   : > { %s377_s7 = scalar_lea.sflag [#allocation4], %s376_s6 }
  0xc8   : > { %p511_p0 = pnand %p515_p13, %p816_p12 }
  0xca   : > { %p512_p1 = pneg %p511_p0 }
  0xcc   : > { %681 = dma.done.wait (%p512_p1), %s377_s7, 256  }
  0xcd   : > { %683 = vsyncadd (%p512_p1), %s377_s7, 4294967040  ;;  %s20_s22 = sadd.s32 1, %s714_s22   ;;  %s920_s27 = sld [smem:[#allocation8_spill]] }
  0xce   : > { %p17_p2 = scmp.ge.s32.totalorder %s20_s22, 6   ;;  %s921_s17 = sld [smem:[#allocation11_spill]] }
  0xcf   : > { %s922_s5 = sld [smem:[#allocation9_spill]]  ;;  %s924_s15 = smov %s690_s16 }
  0xd0   : > { %s923_s26 = sld [smem:[#allocation10_spill]]  ;;  %s926_s18 = smov %s706_s20 }
  0xd1   : > { %s927_s19 = smov %s710_s21 }
  0xd2   :  { %19 = sbr.rel (!%p17_p2) target bundleno = 7 (0x7), region = 81 }
  0xd3   : > { %s925_s16 = smov %s920_s27 }
  0xd5   : > { %s928_s20 = smov %s922_s5 }
  0xd6   : > { %s929_s21 = smov %s923_s26 }
  0xd7   :  { %383 = vsyncpa [#allocation3], 1 }
  0xd8   :  { %385 = vsyncpa [#allocation3 + $0x1], 1 }
  0xd9   :  { %386 = vsyncpa [#allocation4], 1 }
  0xda   :  { %388 = vsyncpa [#allocation4 + $0x1], 1 }

</bundles_post_ra>
